<compile_context>
chip_gen: v5e
topology: v5e:2x2
jax: 0.10.0
libtpu: 0.0.40
codegen_flags: <defaults>
</compile_context>

<pallas_src>
import jax
import jax.numpy as jnp
from jax.experimental import pallas as pl
from jax.experimental.pallas import tpu as pltpu


def _ddpm_noise_kernel(ab_ref, x0_ref, eta_ref, out_ref):
    # ab_ref:  (Bt, 1, 2) f32 per-row scales; [...,0]=sqrt(ab), [...,1]=sqrt(1-ab)
    # x0_ref/eta_ref/out_ref: (Bt, R, 128) lane-dense image tiles.
    a = ab_ref[..., 0:1]                       # (Bt, 1, 1), broadcasts over tile
    b = ab_ref[..., 1:2]                       # (Bt, 1, 1)
    # f32 compute keeps exact parity with the reference on all generations.
    # TODO(synk): on v6e/v7x with bf16 inputs one could compute in bf16 to halve
    # vreg pressure; wall-clock is unchanged (mem-bound), so f32 is kept here.
    x = x0_ref[...].astype(jnp.float32)
    e = eta_ref[...].astype(jnp.float32)
    out_ref[...] = (a * x + b * e).astype(out_ref.dtype)


def ddpm_forward(x0, t, eta, sqrt_alpha_bars, sqrt_one_minus_alpha_bars,
                 batch_tile=64, vmem_budget_bytes=28 * 1024 * 1024):
    n, c, h, w = x0.shape
    f = c * h * w

    # Per-batch scales gathered from precomputed sqrt tables (XLA side), packed
    # into one (n, 1, 2) array -> a single tiny scale DMA per grid step.
    t = t.astype(jnp.int32)
    a = sqrt_alpha_bars[t].astype(jnp.float32)
    b = sqrt_one_minus_alpha_bars[t].astype(jnp.float32)
    ab = jnp.stack([a, b], axis=-1).reshape(n, 1, 2)

    # Lane-dense layout: last dim = 128. If the per-image element count is not
    # a multiple of 128, pad ONLY the feature dim up to a multiple of 1024
    # (8x128) so tiles stay (8,128)-aligned and stores are full-width vst.
    x0f = x0.reshape(n, f)
    etaf = eta.reshape(n, f)
    if f % 128 != 0:
        f_pad = pl.cdiv(f, 1024) * 1024
        x0f = jnp.pad(x0f, ((0, 0), (0, f_pad - f)))
        etaf = jnp.pad(etaf, ((0, 0), (0, f_pad - f)))
    else:
        f_pad = f
    rows, lanes = f_pad // 128, 128
    x0r = x0f.reshape(n, rows, lanes)
    etar = etaf.reshape(n, rows, lanes)

    itemsize = jnp.dtype(x0.dtype).itemsize
    bytes_per_row = rows * lanes * itemsize
    # 3 big arrays (x0, eta, out) x 2 pipeline buffers resident in VMEM.
    max_bt_vmem = max(1, int(vmem_budget_bytes // (6 * bytes_per_row)))
    bt = max(1, min(batch_tile, max_bt_vmem, n))
    if n >= 2:
        # Keep >= 2 grid steps so both v7x TensorCores get work (megacore).
        bt = min(bt, pl.cdiv(n, 2))

    # No batch padding: partial last block is masked by Pallas (safe for this
    # purely elementwise kernel — garbage tail reads never persist).
    grid = (pl.cdiv(n, bt),)

    # Explicit scoped-VMEM limit so v5e's 16 MiB default does not bite; keeps
    # headroom but stays well under every generation's physical VMEM.
    vmem_need = 6 * bt * bytes_per_row + 4 * bt * 2 * 4 + (1 << 20)
    vmem_limit = int(min(max(int(1.25 * vmem_need), 16 << 20), 48 << 20))

    out = pl.pallas_call(
        _ddpm_noise_kernel,
        out_shape=jax.ShapeDtypeStruct((n, rows, lanes), x0.dtype),
        grid_spec=pl.GridSpec(
            grid=grid,
            in_specs=[
                pl.BlockSpec((bt, 1, 2), lambda i: (i, 0, 0)),
                pl.BlockSpec((bt, rows, lanes), lambda i: (i, 0, 0)),
                pl.BlockSpec((bt, rows, lanes), lambda i: (i, 0, 0)),
            ],
            out_specs=pl.BlockSpec((bt, rows, lanes), lambda i: (i, 0, 0)),
        ),
        compiler_params=pltpu.CompilerParams(
            dimension_semantics=("parallel",),
            vmem_limit_bytes=vmem_limit,
        ),
        cost_estimate=pl.CostEstimate(
            flops=3 * n * f_pad,
            transcendentals=0,
            bytes_accessed=3 * n * f_pad * itemsize + n * 2 * 4,
        ),
    )(ab, x0r, etar)

    out = out.reshape(n, f_pad)
    if f_pad != f:
        out = out[:, :f]
    return out.reshape(n, c, h, w)


class DDPMAnime:
    """JAX/Pallas equivalent of DDPM_Anime (forward pass only)."""

    def __init__(self, image_shape=(3, 64, 64), n_steps=200,
                 start_beta=1e-4, end_beta=0.02):
        self.image_shape = image_shape
        self.n_steps = n_steps
        # Deterministic schedule (matches torch.linspace / cumulative product).
        self.betas = jnp.linspace(start_beta, end_beta, n_steps,
                                  dtype=jnp.float32)
        self.alphas = 1.0 - self.betas
        self.alpha_bars = jnp.cumprod(self.alphas)
        # Precompute sqrt tables once (removes per-call sqrt work).
        self.sqrt_alpha_bars = jnp.sqrt(self.alpha_bars)
        self.sqrt_one_minus_alpha_bars = jnp.sqrt(1.0 - self.alpha_bars)
        # TODO(synk): UNet_Anime noise_predictor is only used by .backward(),
        # which is not part of the forward-pass semantics implemented here.

    def forward(self, x0, t, eta):
        return ddpm_forward(x0, t, eta,
                            self.sqrt_alpha_bars,
                            self.sqrt_one_minus_alpha_bars)


if __name__ == "__main__":
    key = jax.random.PRNGKey(0)
    k_x, k_eta = jax.random.split(key)

    n, c, h, w = 2, 3, 64, 64                      # (3, 64, 64) images, batch=2
    x0 = jax.random.normal(k_x, (n, c, h, w), dtype=jnp.float32)
    eta = jax.random.normal(k_eta, (n, c, h, w), dtype=jnp.float32)
    t = jnp.array([5, 123], dtype=jnp.int32)

    ddpm = DDPMAnime(image_shape=(c, h, w), n_steps=200,
                     start_beta=1e-4, end_beta=0.02)

    out = ddpm.forward(x0, t, eta)
    out = jax.block_until_ready(out)

    # Pure-JAX reference check.
    ab = ddpm.alpha_bars[t].reshape(n, 1, 1, 1)
    ref = jnp.sqrt(ab) * x0 + jnp.sqrt(1.0 - ab) * eta
    assert out.shape == x0.shape and out.dtype == x0.dtype
    assert jnp.allclose(out, ref, atol=1e-5, rtol=1e-5)

    print("KERNEL_OK")
</pallas_src>

<mosaic_0001>
module attributes {stable_mosaic.version = 11 : i64} {
  func.func @_ddpm_noise_kernel(%arg0: i32, %arg1: memref<1x1x2xf32, #tpu.memory_space<vmem>>, %arg2: memref<1x96x128xf32, #tpu.memory_space<vmem>>, %arg3: memref<1x96x128xf32, #tpu.memory_space<vmem>>, %arg4: memref<1x96x128xf32, #tpu.memory_space<vmem>>) attributes {dimension_semantics = [#tpu.dimension_semantics<parallel>], iteration_bounds = array<i64: 2>, scalar_prefetch = 0 : i64, scratch_operands = 0 : i64, tpu.core_type = #tpu.core_type<tc>, window_params = [{transform_indices = @transform_0, window_bounds = array<i64: 1, 1, 2>}, {transform_indices = @transform_1, window_bounds = array<i64: 1, 96, 128>}, {transform_indices = @transform_2, window_bounds = array<i64: 1, 96, 128>}, {transform_indices = @transform_3, window_bounds = array<i64: 1, 96, 128>}]} {
    %c0 = arith.constant 0 : index
    %c0_0 = arith.constant 0 : index
    %c0_1 = arith.constant 0 : index
    %0 = vector.load %arg1[%c0, %c0_0, %c0_1] : memref<1x1x2xf32, #tpu.memory_space<vmem>>, vector<1x1x1xf32>
    %c0_2 = arith.constant 0 : index
    %c0_3 = arith.constant 0 : index
    %c1 = arith.constant 1 : index
    %1 = vector.load %arg1[%c0_2, %c0_3, %c1] : memref<1x1x2xf32, #tpu.memory_space<vmem>>, vector<1x1x1xf32>
    %c0_4 = arith.constant 0 : index
    %c0_5 = arith.constant 0 : index
    %c0_6 = arith.constant 0 : index
    %2 = vector.load %arg2[%c0_4, %c0_5, %c0_6] : memref<1x96x128xf32, #tpu.memory_space<vmem>>, vector<1x96x128xf32>
    %c0_7 = arith.constant 0 : index
    %c0_8 = arith.constant 0 : index
    %c0_9 = arith.constant 0 : index
    %3 = vector.load %arg3[%c0_7, %c0_8, %c0_9] : memref<1x96x128xf32, #tpu.memory_space<vmem>>, vector<1x96x128xf32>
    %4 = vector.broadcast %0 : vector<1x1x1xf32> to vector<1x96x128xf32>
    %5 = arith.mulf %4, %2 : vector<1x96x128xf32>
    %6 = vector.broadcast %1 : vector<1x1x1xf32> to vector<1x96x128xf32>
    %7 = arith.mulf %6, %3 : vector<1x96x128xf32>
    %8 = arith.addf %5, %7 : vector<1x96x128xf32>
    %c0_10 = arith.constant 0 : index
    %c0_11 = arith.constant 0 : index
    %c0_12 = arith.constant 0 : index
    %9 = vector.load %arg4[%c0_10, %c0_11, %c0_12] : memref<1x96x128xf32, #tpu.memory_space<vmem>>, vector<1x96x128xf32>
    tpu.vector_store %arg4[%c0_10, %c0_11, %c0_12], %8 {strides = array<i32>} : memref<1x96x128xf32, #tpu.memory_space<vmem>>, vector<1x96x128xf32>,
    return
  }
  func.func @transform_0(%arg0: i32) -> (i32, i32, i32) {
    %c0_i32 = arith.constant 0 : i32
    %c0_i32_0 = arith.constant 0 : i32
    %c0_i32_1 = arith.constant 0 : i32
    return %arg0, %c0_i32, %c0_i32_0 : i32, i32, i32
  }
  func.func @transform_1(%arg0: i32) -> (i32, i32, i32) {
    %c0_i32 = arith.constant 0 : i32
    %c0_i32_0 = arith.constant 0 : i32
    %c0_i32_1 = arith.constant 0 : i32
    return %arg0, %c0_i32, %c0_i32_0 : i32, i32, i32
  }
  func.func @transform_2(%arg0: i32) -> (i32, i32, i32) {
    %c0_i32 = arith.constant 0 : i32
    %c0_i32_0 = arith.constant 0 : i32
    %c0_i32_1 = arith.constant 0 : i32
    return %arg0, %c0_i32, %c0_i32_0 : i32, i32, i32
  }
  func.func @transform_3(%arg0: i32) -> (i32, i32, i32) {
    %c0_i32 = arith.constant 0 : i32
    %c0_i32_0 = arith.constant 0 : i32
    %c0_i32_1 = arith.constant 0 : i32
    return %arg0, %c0_i32, %c0_i32_0 : i32, i32, i32
  }
}

</mosaic_0001>

<bundles_post_ra>
// kernel: tpu_custom_call.1
= control target key start
LH: loop header
LB: loop body
LE: loop exit
PB: predicated region body
PF: predicated region fallthrough
CT: control target
= control target key end

     0   :  { %s993_s0 = inlined_call_operand.hbm [shape: f32[2,1,2], index: 0, kind: input, shape index: {}]   ;;  %s994_s1 = inlined_call_operand.hbm [shape: f32[2,96,128], index: 1, kind: input, shape index: {}]   ;;  %s995_s2 = inlined_call_operand.hbm [shape: f32[2,96,128], index: 2, kind: input, shape index: {}]   ;;  %s996_s3 = inlined_call_operand.hbm [shape: f32[2,96,128], index: 3, kind: output, shape index: {}]  }
   0x1   :  { %1001 = sst [smem:[#allocation13_spill]] %s994_s1 }
   0x2   :  { %8 = vsyncpa [#allocation3], 0 }
   0x3   :  { %10 = vsyncpa [#allocation3 + $0x1], 0 }
   0x4   :  { %11 = vsyncpa [#allocation6], 0 }
   0x5   :  { %13 = vsyncpa [#allocation6 + $0x1], 0 }
   0x6   :  { %14 = vsyncpa [#allocation4], 0 }
   0x7   :  { %16 = vsyncpa [#allocation4 + $0x1], 0  ;;  %s744_s12 = smov 0   ;;  %s746_s13 = smov 0  }
   0x8   :  { %s748_s14 = smov 0   ;;  %s750_s15 = smov 0  }
   0x9 LB: > { %s765_s16 = sadd.s32 4294967295, %s716_s15   ;;  %s476_s17 = sadd.s32 4294967294, %s716_s15   ;;  %s716_s15 = sphi %s750_s15, %s1017_s15   ;;  %s712_s14 = sphi %s748_s14, %s1016_s14   ;;  %s708_s13 = sphi %s746_s13, %s1015_s13   ;;  %s704_s12 = sphi %s744_s12, %s1014_s12  }
   0xa   : > { %s769_s18 = sadd.s32 1, %s716_s15   ;;  %s29_s19 = sadd.s32 1, %s712_s14 }
   0xb   : > { %s26_s20 = ssub.s32 %s716_s15, %s769_s18  ;;  %p36_p0 = scmp.ne.s32.totalorder %s712_s14, %s708_s13 }
   0xc   : > { %p27_p1 = scmp.eq.s32.totalorder %s26_s20, 0  ;;  %p37_p2 = scmp.eq.s32.totalorder %s716_s15, 0 }
   0xd   : > { %p42_p3 = scmp.ne.s32.totalorder %s708_s13, %s704_s12  ;;  %p43_p4 = scmp.eq.s32.totalorder %s765_s16, 0 }
   0xe   : > { %s781_s21 = scalar_select %p27_p1, %s712_s14, %s29_s19  }
   0xf   : > { %p38_p5 = por %p37_p2, %p36_p0  ;;  %p783_p6 = por %p43_p4, %p42_p3 }
  0x10   : > { %1002 = sst [smem:[#allocation12_spill]] %s781_s21  ;;  %p118_p7 = scmp.eq.s32.totalorder %s765_s16, 1 }
  0x11   : > { %p124_p8 = scmp.eq.s32.totalorder %s476_s17, 1  ;;  %p478_p9 = scmp.ge.s32.totalorder %s716_s15, 2 }
  0x12   : > { %p513_p10 = scmp.lt.s32.totalorder %s716_s15, 2  ;;  %p790_p11 = por %p118_p7, %p36_p0 }
  0x13   : > { %p794_p12 = por %p124_p8, %p42_p3  ;;  %s799_s25 = sand.u32 1, %s712_s14  }
  0x14   : > { %p801_p13 = pnand %p513_p10, %p38_p5  ;;  %s161_s27 = sand.u32 1, %s716_s15  }
  0x15   : > { %s997_s28 = smul.u32 96, %s799_s25  ;;  %s1007_s1 = sld [smem:[#allocation13_spill]] }
  0x16   : > { %s998_s29 = smul.u32 96, %s716_s15  ;;  %p481_p0 = scmp.ge.s32.totalorder %s716_s15, 1 }
  0x17   : > { %s165_s30 = scalar_lea.vmem [#allocation5], %s997_s28  ;;  %s816_s9 = scalar_lea.sflag [#allocation6], %s161_s27 }
  0x18   : > { %s173_s4 = sshll.u32 %s165_s30, 4  ;;  %p560_p2 = pneg %p801_p13  ;;  %s174_s4 = int_to_ptr.vmem [resolvable:$true] %s173_s4 }
  0x1b   : > { %s170_s7 = scalar_lea.hbm %s1007_s1, %s998_s29  ;;  %s563_s20 = scalar_lea.hbm %s1007_s1, 192 }
  0x1c   : > { %s171_s8 = sshll.u32 %s170_s7, 4  ;;  %s172_s8 = int_to_ptr.hbm [resolvable:$true] %s171_s8 }
  0x1d   : > { %s556_s10 = sshra.s32 %s172_s8, 4  ;;  %s557_s10 = int_to_ptr.hbm [resolvable:$true] %s556_s10 }
  0x1e   : > { %s558_s11 = scalar_lea.hbm %s557_s10, 96  ;;  %p564_p5 = scmp.lt.s32.totalorder %s557_s10, %s1007_s1 }
  0x1f   : > { %p559_p1 = scmp.ne.s32.totalorder %s557_s10, %s558_s11  ;;  %p565_p7 = scmp.lt.s32.totalorder %s563_s20, %s558_s11 }
  0x21   : > { %p561_p3 = pnand %p560_p2, %p559_p1  ;;  %p566_p8 = por %p565_p7, %p564_p5 }
  0x23   : > { %p562_p4 = pneg %p561_p3 }
  0x25   : > { %p567_p10 = pnand %p566_p8, %p562_p4 }
  0x27   : > { %570 = shalt.err (!%p567_p10)
}
  0x28   : > { %s999_s27 = smov 128   ;;  %s1000_s6 = smov 8  }
  0x29   : > { %505 = dma.hbm_to_vmem [thread:$0]  (!%p801_p13), %s172_s8, 1536, %s174_s4, %s816_s9, %s999_s27, %s999_s27, %s1000_s6  }
  0x2a   : > { %p203_p1 = scmp.lt.s32.totalorder %s716_s15, 3  ;;  %s150_s11 = scalar_lea.hbm %s993_s0, %s716_s15 }
  0x2b   : > { %s152_s19 = sshll.u32 %s150_s11, 4  ;;  %s147_s20 = scalar_lea.vmem [#allocation2], %s799_s25  ;;  %s153_s19 = int_to_ptr.hbm [resolvable:$true] %s152_s19 }
  0x2c   : > { %p842_p3 = pnand %p481_p0, %p203_p1  ;;  %s154_s30 = sshll.u32 %s147_s20, 4  ;;  %s155_s30 = int_to_ptr.vmem [resolvable:$true] %s154_s30 }
  0x2d   : > { %s145_s5 = scalar_lea.sflag [#allocation3], %s799_s25  ;;  %s586_s28 = sshra.s32 %s153_s19, 4  ;;  %s587_s28 = int_to_ptr.hbm [resolvable:$true] %s586_s28 }
  0x2e   : > { %s588_s29 = scalar_lea.hbm %s587_s28, 1  ;;  %s593_s7 = scalar_lea.hbm %s993_s0, 2 }
  0x2f   : > { %p589_p4 = scmp.ne.s32.totalorder %s587_s28, %s588_s29  ;;  %p594_p0 = scmp.lt.s32.totalorder %s587_s28, %s993_s0 }
  0x30   : > { %p595_p8 = scmp.lt.s32.totalorder %s593_s7, %s588_s29 }
  0x31   : > { %p591_p5 = pnand %p589_p4, %p560_p2 }
  0x32   : > { %p596_p10 = por %p595_p8, %p594_p0 }
  0x33   : > { %p592_p7 = pneg %p591_p5 }
  0x35   : > { %p597_p1 = pnand %p596_p10, %p592_p7 }
  0x37   : > { %600 = shalt.err (!%p597_p1)
}
  0x38   : > { %502 = dma.hbm_to_vmem [thread:$0]  (!%p801_p13), %s153_s19, 16, %s155_s30, %s145_s5  }
  0x39   : > { %s1009_s11 = smul.u32 96, %s716_s15  ;;  %s623_s5 = scalar_lea.hbm %s995_s2, 192 }
  0x3a   : > { %s1010_s8 = smul.u32 96, %s799_s25 }
  0x3b   : > { %s192_s4 = scalar_lea.hbm %s995_s2, %s1009_s11 }
  0x3c   : > { %s187_s1 = scalar_lea.vmem [#allocation7], %s1010_s8  ;;  %s193_s27 = sshll.u32 %s192_s4, 4  ;;  %s194_s27 = int_to_ptr.hbm [resolvable:$true] %s193_s27 }
  0x3d   : > { %s195_s21 = sshll.u32 %s187_s1, 4  ;;  %s616_s28 = sshra.s32 %s194_s27, 4  ;;  %s196_s21 = int_to_ptr.vmem [resolvable:$true] %s195_s21  ;;  %s617_s28 = int_to_ptr.hbm [resolvable:$true] %s616_s28 }
  0x3e   : > { %s618_s29 = scalar_lea.hbm %s617_s28, 96  ;;  %p624_p0 = scmp.lt.s32.totalorder %s617_s28, %s995_s2 }
  0x3f   : > { %p619_p4 = scmp.ne.s32.totalorder %s617_s28, %s618_s29  ;;  %p625_p8 = scmp.lt.s32.totalorder %s623_s5, %s618_s29 }
  0x41   : > { %p621_p5 = pnand %p619_p4, %p560_p2  ;;  %p626_p10 = por %p625_p8, %p624_p0 }
  0x43   : > { %p622_p7 = pneg %p621_p5 }
  0x45   : > { %p627_p1 = pnand %p626_p10, %p622_p7 }
  0x47   : > { %630 = shalt.err (!%p627_p1)
}
  0x48   : > { %s1011_s1 = smov 8   ;;  %s1012_s25 = smov 128  }
  0x49   : > { %508 = dma.hbm_to_vmem [thread:$0]  (!%p801_p13), %s194_s27, 1536, %s196_s21, %s816_s9, %s1012_s25, %s1012_s25, %s1011_s1  }
  0x4a   : > { %207 = sbr.rel (%p842_p3) target bundleno = 229 (0xe5), region = 32  ;;  %s884_s10 = sand.u32 (!%p842_p3), 1, %s708_s13  }
  0x4b   : > { %s210_s11 = scalar_lea.sflag (!%p842_p3), [#allocation3], %s884_s10  ;;  %s212_s20 = scalar_lea.vmem (!%p842_p3), [#allocation2], %s884_s10 }
  0x4f   : > { %691 = dma.done.wait (%p783_p6), %s210_s11, 16  }
  0x50   : > { %693 = vsyncadd (%p783_p6), %s210_s11, 4294967280  ;;  %s218_s21 = sand.u32 1, %s765_s16   ;;  %s894_s26 = smul.u32 96, %s884_s10 }
  0x51   : > { %s219_s9 = scalar_lea.sflag [#allocation6], %s218_s21 }
  0x52   : > { %s897_s17 = scalar_lea.vmem [#allocation5], %s894_s26 }
  0x53   : > { %695 = dma.done.wait (%p783_p6), %s219_s9, 3072  }
  0x54   : > { %697 = vsyncadd (%p783_p6), %s219_s9, 4294964224  ;;  %v720_v0 = vmov 0   ;;  %v555_v1 = vld [vmem:[%s212_s20] ss:$0 sm:$0xff]  ;;  %v721_v2 = vmov 1   ;;  %v266_v4 = vld [vmem:[%s897_s17] sm:$0xff] }
  0x55   : > { %553 = vset.pattern.permute.xlu0 %v720_v0  ;;  %s907_s4 = scalar_lea.vmem [#allocation7], %s894_s26  ;;  %v267_v9 = vld [vmem:[%s897_s17 + $0x8] sm:$0xff]  ;;  %v268_v10 = vld [vmem:[%s897_s17 + $0x10] sm:$0xff]  ;;  %v269_v12 = vld [vmem:[%s897_s17 + $0x18] sm:$0xff]  ;;  %s490_s22 = smul.u32 96, %s765_s16 }
  0x56   : > { %293 = vperm.xlu0 %553, %v555_v1   ;;  %v278_v5 = vld [vmem:[%s907_s4] sm:$0xff]  ;;  %v279_v6 = vld [vmem:[%s907_s4 + $0x8] sm:$0xff]  ;;  %v280_v7 = vld [vmem:[%s907_s4 + $0x10] sm:$0xff]  ;;  %s939_s8 = scalar_lea.vmem [#allocation8], %s894_s26  ;;  %s349_s30 = scalar_lea.sflag [#allocation4], %s884_s10 }
  0x57   : > { %v281_v8 = vld [vmem:[%s907_s4 + $0x18] sm:$0xff]  ;;  %v282_v11 = vld [vmem:[%s907_s4 + $0x20] sm:$0xff]  ;;  %v283_v14 = vld [vmem:[%s907_s4 + $0x28] sm:$0xff]  ;;  %s360_s28 = scalar_lea.hbm %s996_s3, %s490_s22  ;;  %s361_s29 = sshll.u32 %s939_s8, 4  ;;  %s362_s29 = int_to_ptr.vmem [resolvable:$true] %s361_s29 }
  0x58   : > { %v270_v13 = vld [vmem:[%s897_s17 + $0x20] sm:$0xff]  ;;  %v284_v16 = vld [vmem:[%s907_s4 + $0x30] sm:$0xff]  ;;  %v271_v21 = vld [vmem:[%s897_s17 + $0x28] sm:$0xff]  ;;  %s363_s19 = sshll.u32 %s360_s28, 4  ;;  %s666_s25 = scalar_lea.hbm %s996_s3, 192  ;;  %s364_s19 = int_to_ptr.hbm [resolvable:$true] %s363_s19 }
  0x59   : > { %v285_v22 = vld [vmem:[%s907_s4 + $0x38] sm:$0xff]  ;;  %v272_v27 = vld [vmem:[%s897_s17 + $0x30] sm:$0xff]  ;;  %v286_v28 = vld [vmem:[%s907_s4 + $0x40] sm:$0xff]  ;;  %s660_s5 = sshra.s32 %s364_s19, 4  ;;  %s661_s5 = int_to_ptr.hbm [resolvable:$true] %s660_s5 }
  0x5a   : > { %v273_v32 = vld [vmem:[%s897_s17 + $0x38] sm:$0xff]  ;;  %v287_v33 = vld [vmem:[%s907_s4 + $0x48] sm:$0xff]  ;;  %v274_v38 = vld [vmem:[%s897_s17 + $0x40] sm:$0xff]  ;;  %s662_s6 = scalar_lea.hbm %s661_s5, 96  ;;  %p667_p3 = scmp.lt.s32.totalorder %s661_s5, %s996_s3 }
  0x5b   : > { %v288_v39 = vld [vmem:[%s907_s4 + $0x50] sm:$0xff]  ;;  %v275_v43 = vld [vmem:[%s897_s17 + $0x48] sm:$0xff]  ;;  %v289_v44 = vld [vmem:[%s907_s4 + $0x58] sm:$0xff]  ;;  %p663_p6 = scmp.ne.s32.totalorder %s661_s5, %s662_s6  ;;  %p668_p4 = scmp.lt.s32.totalorder %s666_s25, %s662_s6 }
  0x5c   : > { %v276_v48 = vld [vmem:[%s897_s17 + $0x50] sm:$0xff]  ;;  %v277_v52 = vld [vmem:[%s897_s17 + $0x58] sm:$0xff] }
  0x5d   : > { %p664_p13 = pnand %p663_p6, %p790_p11  ;;  %p669_p5 = por %p668_p4, %p667_p3 }
  0x5e   : > { %554 = vset.pattern.permute.xlu0 %v721_v2 }
  0x5f   : > { %309 = vperm.xlu0 %554, %v555_v1   ;;  %p665_p2 = pneg %p664_p13 }
  0x61   : > { %p670_p7 = pnand %p669_p5, %p665_p2 }
  0xc8   : > { %v903_v3 = vpop.permute.xlu0 %293 }
  0xc9   : > { %v296_v23 = vmul.f32 %v903_v3, %v266_v4  ;;  %v297_v24 = vmul.f32 %v903_v3, %v267_v9  ;;  %v298_v25 = vmul.f32 %v903_v3, %v268_v10  ;;  %v299_v29 = vmul.f32 %v903_v3, %v269_v12 }
  0xca   : > { %v300_v30 = vmul.f32 %v903_v3, %v270_v13  ;;  %v301_v40 = vmul.f32 %v903_v3, %v271_v21  ;;  %v302_v45 = vmul.f32 %v903_v3, %v272_v27  ;;  %v303_v49 = vmul.f32 %v903_v3, %v273_v32 }
  0xcb   : > { %v304_v53 = vmul.f32 %v903_v3, %v274_v38  ;;  %v305_v56 = vmul.f32 %v903_v3, %v275_v43  ;;  %v306_v59 = vmul.f32 %v903_v3, %v276_v48  ;;  %v307_v61 = vmul.f32 %v903_v3, %v277_v52 }
  0xd1   : > { %v310_v15 = vpop.permute.xlu0 %309 }
  0xd2   : > { %v312_v17 = vmul.f32 %v310_v15, %v278_v5  ;;  %v313_v18 = vmul.f32 %v310_v15, %v279_v6  ;;  %v314_v19 = vmul.f32 %v310_v15, %v280_v7  ;;  %v315_v20 = vmul.f32 %v310_v15, %v281_v8 }
  0xd3   : > { %v316_v26 = vmul.f32 %v310_v15, %v282_v11  ;;  %v317_v31 = vmul.f32 %v310_v15, %v283_v14  ;;  %v318_v34 = vmul.f32 %v310_v15, %v284_v16  ;;  %v319_v41 = vmul.f32 %v310_v15, %v285_v22 }
  0xd4   : > { %v324_v35 = vadd.f32 %v312_v17, %v296_v23  ;;  %v325_v36 = vadd.f32 %v313_v18, %v297_v24  ;;  %v326_v37 = vadd.f32 %v314_v19, %v298_v25  ;;  %v327_v42 = vadd.f32 %v315_v20, %v299_v29 }
  0xd5   : > { %v320_v46 = vmul.f32 %v310_v15, %v286_v28  ;;  %v328_v47 = vadd.f32 %v316_v26, %v300_v30  ;;  %v321_v50 = vmul.f32 %v310_v15, %v287_v33  ;;  %v329_v51 = vadd.f32 %v317_v31, %v301_v40 }
  0xd6   : > { %336 = vst [vmem:[%s939_s8] sm:$0xff] %v324_v35  ;;  %v322_v54 = vmul.f32 %v310_v15, %v288_v39  ;;  %v330_v55 = vadd.f32 %v318_v34, %v302_v45  ;;  %v323_v57 = vmul.f32 %v310_v15, %v289_v44  ;;  %v331_v58 = vadd.f32 %v319_v41, %v303_v49 }
  0xd7   : > { %337 = vst [vmem:[%s939_s8 + $0x8] sm:$0xff] %v325_v36  ;;  %v332_v60 = vadd.f32 %v320_v46, %v304_v53  ;;  %v333_v62 = vadd.f32 %v321_v50, %v305_v56 }
  0xd8   : > { %338 = vst [vmem:[%s939_s8 + $0x10] sm:$0xff] %v326_v37  ;;  %v334_v63 = vadd.f32 %v322_v54, %v306_v59  ;;  %v335_v0 = vadd.f32 %v323_v57, %v307_v61 }
  0xd9   : > { %339 = vst [vmem:[%s939_s8 + $0x18] sm:$0xff] %v327_v42 }
  0xda   : > { %340 = vst [vmem:[%s939_s8 + $0x20] sm:$0xff] %v328_v47 }
  0xdb   : > { %341 = vst [vmem:[%s939_s8 + $0x28] sm:$0xff] %v329_v51 }
  0xdc   : > { %342 = vst [vmem:[%s939_s8 + $0x30] sm:$0xff] %v330_v55 }
  0xdd   : > { %343 = vst [vmem:[%s939_s8 + $0x38] sm:$0xff] %v331_v58 }
  0xde   : > { %344 = vst [vmem:[%s939_s8 + $0x40] sm:$0xff] %v332_v60 }
  0xdf   : > { %345 = vst [vmem:[%s939_s8 + $0x48] sm:$0xff] %v333_v62 }
  0xe0   : > { %346 = vst [vmem:[%s939_s8 + $0x50] sm:$0xff] %v334_v63 }
  0xe1   : > { %347 = vst [vmem:[%s939_s8 + $0x58] sm:$0xff] %v335_v0 }
  0xe2   : > { %673 = shalt.err (!%p670_p7)
}
  0xe3   : > { %s722_s10 = smov 128   ;;  %s723_s21 = smov 8  }
  0xe4   : > { %497 = dma.vmem_to_hbm [thread:$0]  (%p790_p11), %s362_s29, 1536, %s364_s19, %s349_s30, %s722_s10, %s722_s10, %s723_s21  }
  0xe5 PF: > { %s378_s26 = sand.u32 1, %s704_s12   ;;  %p510_p0 = pnand %p478_p9, %p794_p12 }
  0xe6   : > { %s379_s9 = scalar_lea.sflag [#allocation4], %s378_s26 }
  0xe7   : > { %p511_p8 = pneg %p510_p0 }
  0xe9   : > { %699 = dma.done.wait (%p511_p8), %s379_s9, 1536  }
  0xea   : > { %701 = vsyncadd (%p511_p8), %s379_s9, 4294965760  ;;  %s1013_s17 = sld [smem:[#allocation12_spill]]  ;;  %p19_p10 = scmp.ge.s32.totalorder %s769_s18, 4  }
  0xeb   : > { %s1014_s12 = smov %s708_s13  ;;  %s1015_s13 = smov %s712_s14 }
  0xec   : > { %s1017_s15 = smov %s769_s18  ;;  %21 = sbr.rel (!%p19_p10) target bundleno = 9 (0x9), region = 101 }
  0xf0   : > { %s1016_s14 = smov %s1013_s17 }
  0xf1   :  { %385 = vsyncpa [#allocation3], 1 }
  0xf2   :  { %387 = vsyncpa [#allocation3 + $0x1], 1 }
  0xf3   :  { %388 = vsyncpa [#allocation6], 1 }
  0xf4   :  { %390 = vsyncpa [#allocation6 + $0x1], 1 }
  0xf5   :  { %391 = vsyncpa [#allocation4], 1 }
  0xf6   :  { %393 = vsyncpa [#allocation4 + $0x1], 1 }

</bundles_post_ra>
